<compile_context>
chip_gen: v6e
topology: v6e:2x2x1
jax: 0.10.0
libtpu: 0.0.40
codegen_flags: <defaults>
</compile_context>

<pallas_src>
import functools

import jax
import jax.numpy as jnp
from jax.experimental import pallas as pl
from jax.experimental.pallas import tpu as pltpu

_EPSILON = 1e-5
_LANE = 128
# Target HBM bytes per input per pipeline buffer (2 inputs x 2 buffers => ~8 MiB).
_TARGET_BLOCK_BYTES = 2 * 1024 * 1024
# Cap so the two f32 per-lane accumulators stay small even for tiny batches.
_MAX_TILE_N = 64 * 1024


def _round_up(x: int, m: int) -> int:
    return ((x + m - 1) // m) * m


def _dc_kernel(out_ref, tgt_ref, part_ref, acc_num_ref, acc_en_ref,
               *, tile_n: int, n_valid: int, needs_mask: bool):
    """Grid = (shard, tile). Streams (B, TILE_N) tiles, accumulates raw sums."""
    i = pl.program_id(1)

    @pl.when(i == 0)
    def _init():
        acc_num_ref[...] = jnp.zeros_like(acc_num_ref)
        acc_en_ref[...] = jnp.zeros_like(acc_en_ref)

    o = out_ref[...].astype(jnp.float32)
    t = tgt_ref[...].astype(jnp.float32)

    # Per-feature raw batch sums (division by B / N deferred to the wrapper).
    d = jnp.sum(t - o, axis=0, keepdims=True)        # (1, TILE_N)
    e = jnp.sum(t * t, axis=0, keepdims=True)        # (1, TILE_N)

    if needs_mask:
        # Zero out lanes beyond the true feature count (boundary blocks read
        # unspecified padding; duplicate clamped tiles are fully masked).
        start = (pl.program_id(0) * pl.num_programs(1) + i) * tile_n
        lane = jax.lax.broadcasted_iota(jnp.int32, (1, tile_n), 1) + start
        valid = lane < n_valid
        d = jnp.where(valid, d, 0.0)
        e = jnp.where(valid, e, 0.0)

    acc_num_ref[...] += d * d
    acc_en_ref[...] += e

    @pl.when(i == pl.num_programs(1) - 1)
    def _finalize():
        num_sum = jnp.sum(acc_num_ref[...])   # sum_f (sum_b(t) - sum_b(o))^2
        en_sum = jnp.sum(acc_en_ref[...])     # sum_{b,f} t^2
        # Scalars go into sublane rows 0 and 1 of this shard's (1, 8, 128)
        # output block (layout-legal VMEM block, written back once per shard).
        sub = jax.lax.broadcasted_iota(jnp.int32, part_ref.shape, 1)
        part_ref[...] = jnp.where(
            sub == 0, num_sum, jnp.where(sub == 1, en_sum, 0.0)
        ).astype(jnp.float32)


def dc_loss(output: jax.Array, target: jax.Array, *, tile_n: int | None = None):
    """DC loss. output/target: same shape, batch on axis 0."""
    assert output.shape == target.shape, "output/target must have the same shape"
    assert output.ndim >= 1, "DC loss needs a batch dimension"
    b = output.shape[0]
    n = 1
    for d in output.shape[1:]:
        n *= d
    n = max(n, 1)

    out2d = output.reshape(b, n)
    tgt2d = target.reshape(b, n)

    itemsize = max(out2d.dtype.itemsize, tgt2d.dtype.itemsize)
    n_lane = _round_up(n, _LANE)

    # Tile size: multiple of 128 lanes, ~2 MiB of input bytes per step so the
    # DMA pipeline dominates the per-step overhead, capped by the feature
    # count and a sane maximum (keeps VMEM use modest on v7x's 64 MiB).
    if tile_n is None:
        tile_n = _TARGET_BLOCK_BYTES // max(1, b * itemsize)
    tile_n = max(_LANE, min(tile_n, _MAX_TILE_N, n_lane))
    tile_n = (tile_n // _LANE) * _LANE

    num_tiles = pl.cdiv(n, tile_n)
    # Outer "parallel" shard axis: lets v7x megacore split the feature axis
    # across its 2 TensorCores; runs as a plain sequential loop on v5e/v6e.
    num_shards = 2 if num_tiles >= 2 else 1
    tiles_per_shard = pl.cdiv(num_tiles, num_shards)
    covered = num_shards * tiles_per_shard * tile_n
    needs_mask = covered != n
    needs_clamp = num_shards * tiles_per_shard != num_tiles
    last_block = num_tiles - 1

    def in_index(s, i):
        ti = s * tiles_per_shard + i
        if needs_clamp:
            # Odd tile count with 2 shards: the final logical tile would start
            # past the array; clamp it to the last real block (its
            # contribution is zeroed by the in-kernel mask).
            ti = jnp.minimum(ti, last_block)
        return (0, ti)

    kernel = functools.partial(
        _dc_kernel, tile_n=tile_n, n_valid=n, needs_mask=needs_mask)

    parts = pl.pallas_call(
        kernel,
        out_shape=jax.ShapeDtypeStruct((num_shards, 8, _LANE), jnp.float32),
        grid=(num_shards, tiles_per_shard),
        in_specs=[
            pl.BlockSpec((b, tile_n), in_index),
            pl.BlockSpec((b, tile_n), in_index),
        ],
        out_specs=pl.BlockSpec((1, 8, _LANE), lambda s, i: (s, 0, 0)),
        scratch_shapes=[
            pltpu.VMEM((1, tile_n), jnp.float32),   # per-lane numerator sums
            pltpu.VMEM((1, tile_n), jnp.float32),   # per-lane energy sums
        ],
        compiler_params=pltpu.CompilerParams(
            dimension_semantics=("parallel", "arbitrary"),
        ),
        cost_estimate=pl.CostEstimate(
            flops=5 * b * n,
            transcendentals=0,
            bytes_accessed=b * n
            * (out2d.dtype.itemsize + tgt2d.dtype.itemsize)
            + num_shards * 8 * _LANE * 4,
        ),
    )(out2d, tgt2d)

    # Combine per-shard raw sums (tiny epilogue in plain JAX).
    num_sum = jnp.sum(parts[:, 0, 0])
    en_sum = jnp.sum(parts[:, 1, 0])
    loss = num_sum / (float(b) * float(b) * float(n))   # mean_f (mean_b diff)^2
    energy = en_sum / (float(b) * float(n))              # mean(t^2)
    return loss / (energy + _EPSILON)


def _dc_reference(output, target):
    output = output.astype(jnp.float32)
    target = target.astype(jnp.float32)
    diff = jnp.mean(target, axis=0) - jnp.mean(output, axis=0)
    loss = jnp.mean(diff * diff)
    energy = jnp.mean(target * target)
    return loss / (energy + _EPSILON)


if __name__ == "__main__":
    key = jax.random.PRNGKey(0)
    k1, k2, k3, k4, k5, k6 = jax.random.split(key, 6)

    # Small NCHW shapes consistent with a dense prediction / signal loss.
    B, C, H, W = 2, 4, 16, 16
    output = jax.random.normal(k1, (B, C, H, W), dtype=jnp.float32)
    target = jax.random.normal(k2, (B, C, H, W), dtype=jnp.float32)

    loss = dc_loss(output, target)
    jax.block_until_ready(loss)
    ref = _dc_reference(output, target)
    assert jnp.allclose(loss, ref, rtol=1e-5, atol=1e-6), (loss, ref)

    # Ragged feature count: multi-tile, 2 shards, in-kernel lane masking
    # (no host-side padding copies).
    out_b = jax.random.normal(k3, (2, 3, 17, 19), dtype=jnp.float32)
    tgt_b = jax.random.normal(k4, (2, 3, 17, 19), dtype=jnp.float32)
    loss_b = dc_loss(out_b, tgt_b, tile_n=256)
    jax.block_until_ready(loss_b)
    ref_b = _dc_reference(out_b, tgt_b)
    assert jnp.allclose(loss_b, ref_b, rtol=1e-5, atol=1e-6), (loss_b, ref_b)

    # Odd tile count: exercises the clamped (fully-masked) duplicate tile on
    # the second shard.
    out_c = jax.random.normal(k5, (2, 3, 10, 41), dtype=jnp.float32)
    tgt_c = jax.random.normal(k6, (2, 3, 10, 41), dtype=jnp.float32)
    loss_c = dc_loss(out_c, tgt_c, tile_n=256)
    jax.block_until_ready(loss_c)
    ref_c = _dc_reference(out_c, tgt_c)
    assert jnp.allclose(loss_c, ref_c, rtol=1e-5, atol=1e-6), (loss_c, ref_c)

    # bf16 inputs are streamed natively (halves HBM traffic) and accumulated
    # in f32 inside the kernel.
    loss_h = dc_loss(output.astype(jnp.bfloat16), target.astype(jnp.bfloat16))
    jax.block_until_ready(loss_h)
    ref_h = _dc_reference(output.astype(jnp.bfloat16), target.astype(jnp.bfloat16))
    assert jnp.allclose(loss_h, ref_h, rtol=1e-4, atol=1e-5), (loss_h, ref_h)

    print("KERNEL_OK")
</pallas_src>

<mosaic_0001>
module attributes {stable_mosaic.version = 11 : i64} {
  func.func @_dc_kernel(%arg0: i32, %arg1: i32, %arg2: memref<2x1024xf32, #tpu.memory_space<vmem>>, %arg3: memref<2x1024xf32, #tpu.memory_space<vmem>>, %arg4: memref<1x8x128xf32, #tpu.memory_space<vmem>>, %arg5: memref<1x1024xf32, #tpu.memory_space<vmem>>, %arg6: memref<1x1024xf32, #tpu.memory_space<vmem>>) attributes {dimension_semantics = [#tpu.dimension_semantics<parallel>, #tpu.dimension_semantics<arbitrary>], iteration_bounds = array<i64: 1, 1>, scalar_prefetch = 0 : i64, scratch_operands = 2 : i64, tpu.core_type = #tpu.core_type<tc>, window_params = [{transform_indices = @transform_0, window_bounds = array<i64: 2, 1024>}, {transform_indices = @transform_1, window_bounds = array<i64: 2, 1024>}, {transform_indices = @transform_2, window_bounds = array<i64: 1, 8, 128>}]} {
    %c0_i32 = arith.constant 0 : i32
    %0 = arith.cmpi eq, %arg1, %c0_i32 : i32
    %1 = arith.extui %0 : i1 to i32
    %c0_i32_0 = arith.constant 0 : i32
    %2 = arith.cmpi ne, %1, %c0_i32_0 : i32
    scf.if %2 {
      %cst_15 = arith.constant 0.000000e+00 : f32
      %21 = vector.broadcast %cst_15 : f32 to vector<1x1024xf32>
      %c0_16 = arith.constant 0 : index
      %c0_17 = arith.constant 0 : index
      %22 = vector.load %arg5[%c0_16, %c0_17] : memref<1x1024xf32, #tpu.memory_space<vmem>>, vector<1x1024xf32>
      tpu.vector_store %arg5[%c0_16, %c0_17], %21 {strides = array<i32>} : memref<1x1024xf32, #tpu.memory_space<vmem>>, vector<1x1024xf32>,
      %cst_18 = arith.constant 0.000000e+00 : f32
      %23 = vector.broadcast %cst_18 : f32 to vector<1x1024xf32>
      %c0_19 = arith.constant 0 : index
      %c0_20 = arith.constant 0 : index
      %24 = vector.load %arg6[%c0_19, %c0_20] : memref<1x1024xf32, #tpu.memory_space<vmem>>, vector<1x1024xf32>
      tpu.vector_store %arg6[%c0_19, %c0_20], %23 {strides = array<i32>} : memref<1x1024xf32, #tpu.memory_space<vmem>>, vector<1x1024xf32>,
    } else {
    }
    %c0 = arith.constant 0 : index
    %c0_1 = arith.constant 0 : index
    %3 = vector.load %arg2[%c0, %c0_1] : memref<2x1024xf32, #tpu.memory_space<vmem>>, vector<2x1024xf32>
    %c0_2 = arith.constant 0 : index
    %c0_3 = arith.constant 0 : index
    %4 = vector.load %arg3[%c0_2, %c0_3] : memref<2x1024xf32, #tpu.memory_space<vmem>>, vector<2x1024xf32>
    %5 = arith.subf %4, %3 : vector<2x1024xf32>
    %cst = arith.constant dense<0.000000e+00> : vector<1024xf32>
    %6 = vector.multi_reduction <add>, %5, %cst [0] : vector<2x1024xf32> to vector<1024xf32>
    %7 = vector.shape_cast %6 : vector<1024xf32> to vector<1x1024xf32>
    %8 = arith.mulf %4, %4 : vector<2x1024xf32>
    %cst_4 = arith.constant dense<0.000000e+00> : vector<1024xf32>
    %9 = vector.multi_reduction <add>, %8, %cst_4 [0] : vector<2x1024xf32> to vector<1024xf32>
    %10 = vector.shape_cast %9 : vector<1024xf32> to vector<1x1024xf32>
    %c0_5 = arith.constant 0 : index
    %c0_6 = arith.constant 0 : index
    %11 = vector.load %arg5[%c0_5, %c0_6] : memref<1x1024xf32, #tpu.memory_space<vmem>>, vector<1x1024xf32>
    %12 = arith.mulf %7, %7 : vector<1x1024xf32>
    %13 = arith.addf %11, %12 : vector<1x1024xf32>
    %c0_7 = arith.constant 0 : index
    %c0_8 = arith.constant 0 : index
    %14 = vector.load %arg5[%c0_7, %c0_8] : memref<1x1024xf32, #tpu.memory_space<vmem>>, vector<1x1024xf32>
    tpu.vector_store %arg5[%c0_7, %c0_8], %13 {strides = array<i32>} : memref<1x1024xf32, #tpu.memory_space<vmem>>, vector<1x1024xf32>,
    %c0_9 = arith.constant 0 : index
    %c0_10 = arith.constant 0 : index
    %15 = vector.load %arg6[%c0_9, %c0_10] : memref<1x1024xf32, #tpu.memory_space<vmem>>, vector<1x1024xf32>
    %16 = arith.addf %15, %10 : vector<1x1024xf32>
    %c0_11 = arith.constant 0 : index
    %c0_12 = arith.constant 0 : index
    %17 = vector.load %arg6[%c0_11, %c0_12] : memref<1x1024xf32, #tpu.memory_space<vmem>>, vector<1x1024xf32>
    tpu.vector_store %arg6[%c0_11, %c0_12], %16 {strides = array<i32>} : memref<1x1024xf32, #tpu.memory_space<vmem>>, vector<1x1024xf32>,
    %c0_i32_13 = arith.constant 0 : i32
    %18 = arith.cmpi eq, %arg1, %c0_i32_13 : i32
    %19 = arith.extui %18 : i1 to i32
    %c0_i32_14 = arith.constant 0 : i32
    %20 = arith.cmpi ne, %19, %c0_i32_14 : i32
    scf.if %20 {
      %c0_15 = arith.constant 0 : index
      %c0_16 = arith.constant 0 : index
      %21 = vector.load %arg5[%c0_15, %c0_16] : memref<1x1024xf32, #tpu.memory_space<vmem>>, vector<1x1024xf32>
      %22 = vector.shape_cast %21 : vector<1x1024xf32> to vector<1x1x1024xf32>
      %cst_17 = arith.constant dense<0.000000e+00> : vector<1xf32>
      %23 = vector.multi_reduction <add>, %22, %cst_17 [1, 2] : vector<1x1x1024xf32> to vector<1xf32>
      %24 = vector.shape_cast %23 : vector<1xf32> to vector<1x1x1xf32>
      %25 = vector.extract %24[0, 0, 0] : f32 from vector<1x1x1xf32>
      %c0_18 = arith.constant 0 : index
      %c0_19 = arith.constant 0 : index
      %26 = vector.load %arg6[%c0_18, %c0_19] : memref<1x1024xf32, #tpu.memory_space<vmem>>, vector<1x1024xf32>
      %27 = vector.shape_cast %26 : vector<1x1024xf32> to vector<1x1x1024xf32>
      %cst_20 = arith.constant dense<0.000000e+00> : vector<1xf32>
      %28 = vector.multi_reduction <add>, %27, %cst_20 [1, 2] : vector<1x1x1024xf32> to vector<1xf32>
      %29 = vector.shape_cast %28 : vector<1xf32> to vector<1x1x1xf32>
      %30 = vector.extract %29[0, 0, 0] : f32 from vector<1x1x1xf32>
      %31 = tpu.iota {dimensions = array<i32: 1>} : vector<1x8x128xi32>
      %c0_i32_21 = arith.constant 0 : i32
      %32 = vector.broadcast %c0_i32_21 : i32 to vector<1x8x128xi32>
      %33 = arith.cmpi eq, %31, %32 : vector<1x8x128xi32>
      %c1_i32 = arith.constant 1 : i32
      %34 = vector.broadcast %c1_i32 : i32 to vector<1x8x128xi32>
      %35 = arith.cmpi eq, %31, %34 : vector<1x8x128xi32>
      %cst_22 = arith.constant 0.000000e+00 : f32
      %36 = vector.broadcast %30 : f32 to vector<1x8x128xf32>
      %37 = vector.broadcast %cst_22 : f32 to vector<1x8x128xf32>
      %38 = arith.select %35, %36, %37 : vector<1x8x128xi1>, vector<1x8x128xf32>
      %39 = vector.broadcast %25 : f32 to vector<1x8x128xf32>
      %40 = arith.select %33, %39, %38 : vector<1x8x128xi1>, vector<1x8x128xf32>
      %c0_23 = arith.constant 0 : index
      %c0_24 = arith.constant 0 : index
      %c0_25 = arith.constant 0 : index
      %41 = vector.load %arg4[%c0_23, %c0_24, %c0_25] : memref<1x8x128xf32, #tpu.memory_space<vmem>>, vector<1x8x128xf32>
      tpu.vector_store %arg4[%c0_23, %c0_24, %c0_25], %40 {strides = array<i32>} : memref<1x8x128xf32, #tpu.memory_space<vmem>>, vector<1x8x128xf32>,
    } else {
    }
    return
  }
  func.func @transform_0(%arg0: i32, %arg1: i32) -> (i32, i32) {
    %c1_i32 = arith.constant 1 : i32
    %0 = arith.muli %arg0, %c1_i32 : i32
    %1 = arith.addi %0, %arg1 : i32
    %c0_i32 = arith.constant 0 : i32
    %c0_i32_0 = arith.constant 0 : i32
    return %c0_i32, %1 : i32, i32
  }
  func.func @transform_1(%arg0: i32, %arg1: i32) -> (i32, i32) {
    %c1_i32 = arith.constant 1 : i32
    %0 = arith.muli %arg0, %c1_i32 : i32
    %1 = arith.addi %0, %arg1 : i32
    %c0_i32 = arith.constant 0 : i32
    %c0_i32_0 = arith.constant 0 : i32
    return %c0_i32, %1 : i32, i32
  }
  func.func @transform_2(%arg0: i32, %arg1: i32) -> (i32, i32, i32) {
    %c0_i32 = arith.constant 0 : i32
    %c0_i32_0 = arith.constant 0 : i32
    %c0_i32_1 = arith.constant 0 : i32
    return %arg0, %c0_i32, %c0_i32_0 : i32, i32, i32
  }
}

</mosaic_0001>

<bundles_post_ra>
// kernel: tpu_custom_call.1
= control target key start
LH: loop header
LB: loop body
LE: loop exit
PB: predicated region body
PF: predicated region fallthrough
CT: control target
= control target key end

     0   :  { %7 = vsyncpa [#allocation5], 0  ;;  %s783_s0 = inlined_call_operand.hbm [shape: f32[2,1024], index: 0, kind: input, shape index: {}]   ;;  %s784_s1 = inlined_call_operand.hbm [shape: f32[2,1024], index: 1, kind: input, shape index: {}]   ;;  %s785_s2 = inlined_call_operand.hbm [shape: f32[1,8,128], index: 2, kind: output, shape index: {}]  }
   0x1   :  { %8 = vsyncpa [#allocation8], 0 }
   0x2   :  { %9 = vsyncpa [#allocation6], 0  ;;  %s629_s9 = smov [#allocation4]   ;;  %s630_s11 = smov [#allocation7]  }
   0x3   :  { %s20_s10 = sshll.u32 %s629_s9, 4  ;;  %s34_s12 = sshll.u32 %s630_s11, 4  ;;  %s21_s10 = int_to_ptr.vmem [resolvable:$true] %s20_s10  ;;  %s35_s12 = int_to_ptr.vmem [resolvable:$true] %s34_s12 }
   0x4   :  { %s571_s13 = scalar_lea.vmem %s21_s10, 256  ;;  %p576_p1 = scmp.lt.s32.totalorder %s21_s10, %s21_s10 }
   0x5   :  { %p572_p0 = scmp.ne.s32.totalorder %s21_s10, %s571_s13  ;;  %p577_p2 = scmp.lt.s32.totalorder %s571_s13, %s571_s13 }
   0x7   :  { %p578_p3 = por %p577_p2, %p576_p1 }
   0x9   :  { %p579_p4 = pnand %p578_p3, %p572_p0 }
   0xb   :  { %582 = shalt.err (!%p579_p4)
}
   0xc   :  { %23 = dma.hbm_to_vmem [thread:$0]  %s783_s0, 256, %s21_s10, [#allocation5]  }
   0xd   :  { %s591_s16 = scalar_lea.vmem %s35_s12, 256  ;;  %p596_p6 = scmp.lt.s32.totalorder %s35_s12, %s35_s12 }
   0xe   :  { %p592_p5 = scmp.ne.s32.totalorder %s35_s12, %s591_s16  ;;  %p597_p7 = scmp.lt.s32.totalorder %s591_s16, %s591_s16 }
  0x10   :  { %p598_p8 = por %p597_p7, %p596_p6 }
  0x12   :  { %p599_p9 = pnand %p598_p8, %p592_p5 }
  0x14   :  { %602 = shalt.err (!%p599_p9)
}
  0x15   :  { %37 = dma.hbm_to_vmem [thread:$0]  %s784_s1, 256, %s35_s12, [#allocation8]  }
  0x16   :  { %623 = dma.done.wait [#allocation5], 256  }
  0x17   :  { %624 = vsyncadd [#allocation5], 4294967040 }
  0x18   :  { %625 = dma.done.wait [#allocation8], 256  }
  0x19   :  { %626 = vsyncadd [#allocation8], 4294967040  ;;  %v66_v0 = vlaneseq  ;;  %v631_v1 = vmov 1983009808   ;;  %v632_v4 = vmov 1966171168  }
  0x1a   :  { %v64_v2 = vunpack.c.l.s4 %v631_v1  ;;  %v285_v5 = vunpack.c.l.s4 %v632_v4  ;;  %v54_v9 = vld [vmem:[#allocation4] sm:$0xff]  ;;  %v55_v10 = vld [vmem:[#allocation4 + $0x8] sm:$0xff]  ;;  %v56_v11 = vld [vmem:[#allocation7] sm:$0xff]  ;;  %vm104_vm0 = vcmask 1041408   ;;  %vm438_vm1 = vcmask 1040384   ;;  %s633_s1 = smov [#allocation9]  }
  0x1b   :  { %v655_v3 = vshrl.u32 %v66_v0, 7  ;;  %v57_v12 = vld [vmem:[#allocation7 + $0x8] sm:$0xff]  ;;  %v58_v13 = vsub.f32 %v56_v11, %v54_v9  ;;  %v161_v14 = vmul.f32 %v56_v11, %v56_v11  ;;  %s544_s19 = sshll.u32 %s633_s1, 4  ;;  %s545_s19 = int_to_ptr.vmem [resolvable:$true] %s544_s19 }
  0x1c   :  { %v65_v6 = vunpack.c.0.s8 %v64_v2  ;;  %v286_v8 = vunpack.c.0.s8 %v285_v5  ;;  %v59_v15 = vsub.f32 %v57_v12, %v55_v10  ;;  %v662_v18 = vmul.f32 %v57_v12, %v57_v12  ;;  %s603_s21 = scalar_lea.vmem %s545_s19, 128  ;;  %p608_p11 = scmp.lt.s32.totalorder %s545_s19, %s545_s19 }
  0x1d   :  { %v400_v16 = vsub.s32 0, %v655_v3  ;;  %v404_v17 = vsub.s32 1, %v655_v3  ;;  %v62_v19 = vcombine.high %v58_v13, %v58_v13  ;;  %v165_v22 = vcombine.high %v161_v14, %v161_v14  ;;  %p604_p10 = scmp.ne.s32.totalorder %s545_s19, %s603_s21  ;;  %p609_p12 = scmp.lt.s32.totalorder %s603_s21, %s603_s21 }
  0x1e   :  { %v658_v7 = vsub.s32 %v65_v6, %v655_v3  ;;  %v666_v21 = vsub.s32 %v286_v8, %v655_v3  ;;  %v79_v23 = vcombine.high %v59_v15, %v59_v15  ;;  %v182_v26 = vcombine.high %v662_v18, %v662_v18 }
  0x1f   :  { %vm532_vm2 = vcmp.eq.s32.totalorder %v655_v3, 1  ;;  %vm531_vm3 = vcmp.eq.s32.totalorder %v655_v3, 0  ;;  %p610_p13 = por %p609_p12, %p608_p11 }
  0x20   :  { %v69_v20 = vrot.slane %v58_v13, %v658_v7  ;;  %v86_v24 = vrot.slane %v59_v15, %v658_v7  ;;  %v670_v25 = vrot.slane %v161_v14, %v658_v7  ;;  %v76_v27 = vrot.slane %v62_v19, %v658_v7 }
  0x21   :  { %v677_v30 = vrot.slane %v165_v22, %v658_v7  ;;  %v93_v31 = vrot.slane %v79_v23, %v658_v7  ;;  %p611_p0 = pnand %p610_p13, %p604_p10 }
  0x22   :  { %v77_v28 = vcombine.high %v69_v20, %v69_v20  ;;  %v105_v29 = vsel %vm104_vm0, %v69_v20, 0.0  ;;  %v94_v32 = vcombine.high %v86_v24, %v86_v24  ;;  %v133_v34 = vsel %vm104_vm0, %v86_v24, 0.0 }
  0x23   :  { %v106_v33 = vrot.slane %v105_v29, 4  ;;  %v78_v35 = vcombine.high %v76_v27, %v76_v27  ;;  %v119_v37 = vsel %vm104_vm0, %v76_v27, 0.0  ;;  %v134_v38 = vrot.slane %v133_v34, 4 }
  0x24   :  { %v112_v36 = vsel %vm104_vm0, %v77_v28, 0.0  ;;  %v95_v39 = vcombine.high %v93_v31, %v93_v31  ;;  %v120_v42 = vrot.slane %v119_v37, 4  ;;  %v140_v45 = vsel %vm104_vm0, %v94_v32, 0.0 }
  0x25   :  { %v107_v40 = vadd.f32 %v106_v33, %v105_v29  ;;  %v113_v41 = vrot.slane %v112_v36, 4  ;;  %v126_v43 = vsel %vm104_vm0, %v78_v35, 0.0  ;;  %v135_v44 = vadd.f32 %v134_v38, %v133_v34 }
  0x26   :  { %v147_v46 = vsel %vm104_vm0, %v93_v31, 0.0  ;;  %v121_v49 = vadd.f32 %v120_v42, %v119_v37  ;;  %v127_v50 = vrot.slane %v126_v43, 4  ;;  %v141_v52 = vrot.slane %v140_v45, 4 }
  0x27   :  { %v108_v47 = vrot.slane %v107_v40, 2  ;;  %v114_v48 = vadd.f32 %v113_v41, %v112_v36  ;;  %v136_v51 = vrot.slane %v135_v44, 2  ;;  %v148_v53 = vrot.slane %v147_v46, 4 }
  0x28   :  { %v154_v54 = vsel %vm104_vm0, %v95_v39, 0.0  ;;  %v122_v57 = vrot.slane %v121_v49, 2  ;;  %v128_v58 = vadd.f32 %v127_v50, %v126_v43  ;;  %v142_v60 = vadd.f32 %v141_v52, %v140_v45 }
  0x29   :  { %v109_v55 = vadd.f32 %v108_v47, %v107_v40  ;;  %v115_v56 = vrot.slane %v114_v48, 2  ;;  %v137_v59 = vadd.f32 %v136_v51, %v135_v44  ;;  %v149_v61 = vadd.f32 %v148_v53, %v147_v46 }
  0x2a   :  { %v155_v62 = vrot.slane %v154_v54, 4  ;;  %v123_v1 = vadd.f32 %v122_v57, %v121_v49  ;;  %v129_v2 = vrot.slane %v128_v58, 2  ;;  %v143_v5 = vrot.slane %v142_v60, 2 }
  0x2b   :  { %v110_v63 = vrot.slane %v109_v55, 1  ;;  %v116_v0 = vadd.f32 %v115_v56, %v114_v48  ;;  %v138_v4 = vrot.slane %v137_v59, 1  ;;  %v150_v6 = vrot.slane %v149_v61, 2 }
  0x2c   :  { %v156_v8 = vadd.f32 %v155_v62, %v154_v54  ;;  %v124_v11 = vrot.slane %v123_v1, 1  ;;  %v130_v12 = vadd.f32 %v129_v2, %v128_v58  ;;  %v144_v14 = vadd.f32 %v143_v5, %v142_v60 }
  0x2d   :  { %v111_v9 = vadd.f32 %v110_v63, %v109_v55  ;;  %v117_v10 = vrot.slane %v116_v0, 1  ;;  %v139_v13 = vadd.f32 %v138_v4, %v137_v59  ;;  %v151_v15 = vadd.f32 %v150_v6, %v149_v61 }
  0x2e   :  { %v157_v19 = vrot.slane %v156_v8, 2  ;;  %v125_v22 = vadd.f32 %v124_v11, %v123_v1  ;;  %v131_v23 = vrot.slane %v130_v12, 1  ;;  %v145_v27 = vrot.slane %v144_v14, 1 }
  0x2f   :  { %v118_v20 = vadd.f32 %v117_v10, %v116_v0  ;;  %v264_v24 = vmul.f32 %v111_v9, %v111_v9  ;;  %v152_v28 = vrot.slane %v151_v15, 1  ;;  %v189_v31 = vrot.slane %v662_v18, %v658_v7 }
  0x30   :  { %v158_v29 = vadd.f32 %v157_v19, %v156_v8  ;;  %v132_v32 = vadd.f32 %v131_v23, %v130_v12  ;;  %v266_v34 = vmul.f32 %v125_v22, %v125_v22  ;;  %v268_v35 = vmul.f32 %v139_v13, %v139_v13 }
  0x31   :  { %v265_v33 = vmul.f32 %v118_v20, %v118_v20  ;;  %v146_v36 = vadd.f32 %v145_v27, %v144_v14  ;;  %v153_v37 = vadd.f32 %v152_v28, %v151_v15  ;;  %v180_v39 = vcombine.high %v670_v25, %v670_v25 }
  0x32   :  { %v159_v38 = vrot.slane %v158_v29, 1  ;;  %v267_v40 = vmul.f32 %v132_v32, %v132_v32  ;;  %v181_v42 = vcombine.high %v677_v30, %v677_v30  ;;  %v697_v43 = vrot.slane %v182_v26, %v658_v7 }
  0x33   :  { %v280_v41 = vcombine.low %v264_v24, %v265_v33  ;;  %v269_v45 = vmul.f32 %v146_v36, %v146_v36  ;;  %v270_v46 = vmul.f32 %v153_v37, %v153_v37  ;;  %v207_v47 = vsel %vm104_vm0, %v670_v25, 0.0 }
  0x34   :  { %v160_v44 = vadd.f32 %v159_v38, %v158_v29  ;;  %v281_v48 = vcombine.low %v266_v34, %v267_v40  ;;  %v197_v50 = vcombine.high %v189_v31, %v189_v31  ;;  %v208_v51 = vrot.slane %v207_v47, 4 }
  0x35   :  { %v290_v49 = vrot.slane %v280_v41, %v666_v21  ;;  %v282_v53 = vcombine.low %v268_v35, %v269_v45  ;;  %v214_v54 = vsel %vm104_vm0, %v180_v39, 0.0  ;;  %v221_v18 = vsel %vm104_vm0, %v677_v30, 0.0 }
  0x36   :  { %v271_v52 = vmul.f32 %v160_v44, %v160_v44  ;;  %v297_v7 = vrot.slane %v281_v48, %v666_v21  ;;  %v209_v26 = vadd.f32 %v208_v51, %v207_v47  ;;  %v215_v55 = vrot.slane %v214_v54, 4 }
  0x37   :  { %v222_v56 = vrot.slane %v221_v18, 4  ;;  %v304_v25 = vrot.slane %v282_v53, %v666_v21  ;;  %v228_v58 = vsel %vm104_vm0, %v181_v42, 0.0  ;;  %v235_v59 = vsel %vm104_vm0, %v189_v31, 0.0 }
  0x38   :  { %v283_v57 = vcombine.low %v270_v46, %v271_v52  ;;  %v312_v60 = vcombine.low %v290_v49, %v297_v7  ;;  %v210_v61 = vrot.slane %v209_v26, 2  ;;  %v216_v62 = vadd.f32 %v215_v55, %v214_v54 }
  0x39   :  { %v223_v63 = vadd.f32 %v222_v56, %v221_v18  ;;  %v229_v30 = vrot.slane %v228_v58, 4  ;;  %v236_v1 = vrot.slane %v235_v59, 4  ;;  %v242_v2 = vsel %vm104_vm0, %v197_v50, 0.0 }
  0x3a   :  { %v311_v0 = vrot.slane %v283_v57, %v666_v21  ;;  %v320_v4 = vrot.slane %v312_v60, %v666_v21  ;;  %v211_v5 = vadd.f32 %v210_v61, %v209_v26  ;;  %v217_v6 = vrot.slane %v216_v62, 2 }
  0x3b   :  { %v224_v8 = vrot.slane %v223_v63, 2  ;;  %v230_v10 = vadd.f32 %v229_v30, %v228_v58  ;;  %v237_v11 = vadd.f32 %v236_v1, %v235_v59  ;;  %v243_v12 = vrot.slane %v242_v2, 4 }
  0x3c   :  { %v313_v9 = vcombine.low %v304_v25, %v311_v0  ;;  %v408_v13 = vsub.s32 2, %v655_v3  ;;  %v412_v14 = vsub.s32 3, %v655_v3  ;;  %v218_v15 = vadd.f32 %v217_v6, %v216_v62 }
  0x3d   :  { %v249_v19 = vsel %vm104_vm0, %v697_v43, 0.0  ;;  %v231_v22 = vrot.slane %v230_v10, 2  ;;  %v238_v23 = vrot.slane %v237_v11, 2  ;;  %v244_v24 = vadd.f32 %v243_v12, %v242_v2 }
  0x3e   :  { %v327_v20 = vrot.slane %v313_v9, %v666_v21  ;;  %v416_v27 = vsub.s32 4, %v655_v3  ;;  %v198_v28 = vcombine.high %v697_v43, %v697_v43  ;;  %v225_v29 = vadd.f32 %v224_v8, %v223_v63 }
  0x3f   :  { %v250_v31 = vrot.slane %v249_v19, 4  ;;  %v420_v33 = vsub.s32 5, %v655_v3  ;;  %v424_v34 = vsub.s32 6, %v655_v3  ;;  %v212_v35 = vrot.slane %v211_v5, 1 }
  0x40   :  { %v328_v32 = vcombine.low %v320_v4, %v327_v20  ;;  %v219_v36 = vrot.slane %v218_v15, 1  ;;  %v232_v37 = vadd.f32 %v231_v22, %v230_v10  ;;  %v239_v38 = vadd.f32 %v238_v23, %v237_v11 }
  0x41   :  { %v245_v39 = vrot.slane %v244_v24, 2  ;;  %v428_v44 = vsub.s32 7, %v655_v3  ;;  %v226_v45 = vrot.slane %v225_v29, 1  ;;  %v251_v46 = vadd.f32 %v250_v31, %v249_v19 }
  0x42   :  { %v401_v40 = vrot.slane %v328_v32, %v400_v16  ;;  %v405_v41 = vrot.slane %v328_v32, %v404_v17  ;;  %v409_v42 = vrot.slane %v328_v32, %v408_v13  ;;  %v413_v43 = vrot.slane %v328_v32, %v412_v14 }
  0x43   :  { %v256_v47 = vsel %vm104_vm0, %v198_v28, 0.0  ;;  %v417_v48 = vrot.slane %v328_v32, %v416_v27  ;;  %v421_v52 = vrot.slane %v328_v32, %v420_v33  ;;  %v213_v54 = vadd.f32 %v212_v35, %v211_v5 }
  0x44   :  { %v439_v49 = vsel %vm438_vm1, %v401_v40, 0.0  ;;  %v440_v50 = vsel %vm438_vm1, %v405_v41, 0.0  ;;  %v442_v51 = vsel %vm438_vm1, %v409_v42, 0.0  ;;  %v220_v18 = vadd.f32 %v219_v36, %v218_v15 }
  0x45   :  { %v441_v53 = vadd.f32 %v440_v50, %v439_v49  ;;  %v444_v7 = vsel %vm438_vm1, %v413_v43, 0.0  ;;  %v233_v26 = vrot.slane %v232_v37, 1  ;;  %v240_v55 = vrot.slane %v239_v38, 1 }
  0x46   :  { %v246_v56 = vadd.f32 %v245_v39, %v244_v24  ;;  %v227_v25 = vadd.f32 %v226_v45, %v225_v29  ;;  %v252_v58 = vrot.slane %v251_v46, 2  ;;  %v257_v59 = vrot.slane %v256_v47, 4 }
  0x47   :  { %v443_v57 = vadd.f32 %v442_v51, %v441_v53  ;;  %v425_v60 = vrot.slane %v328_v32, %v424_v34  ;;  %v446_v61 = vsel %vm438_vm1, %v417_v48, 0.0  ;;  %v234_v62 = vadd.f32 %v233_v26, %v232_v37 }
  0x48   :  { %v247_v63 = vrot.slane %v246_v56, 1  ;;  %v429_v0 = vrot.slane %v328_v32, %v428_v44  ;;  %v253_v1 = vadd.f32 %v252_v58, %v251_v46  ;;  %v258_v2 = vadd.f32 %v257_v59, %v256_v47 }
  0x49   :  { %v445_v30 = vadd.f32 %v444_v7, %v443_v57  ;;  %v448_v4 = vsel %vm438_vm1, %v421_v52, 0.0  ;;  %v241_v5 = vadd.f32 %v240_v55, %v239_v38  ;;  %v341_v8 = vcombine.low %v213_v54, %v220_v18 }
  0x4a   :  { %v248_v6 = vadd.f32 %v247_v63, %v246_v56  ;;  %v254_v10 = vrot.slane %v253_v1, 1  ;;  %v259_v11 = vrot.slane %v258_v2, 2  ;;  %v342_v12 = vcombine.low %v227_v25, %v234_v62 }
  0x4b   :  { %v447_v9 = vadd.f32 %v446_v61, %v445_v30  ;;  %v450_v15 = vsel %vm438_vm1, %v425_v60, 0.0  ;;  %v452_v22 = vsel %vm438_vm1, %v429_v0, 0.0  ;;  %v351_v24 = vrot.slane %v341_v8, %v666_v21 }
  0x4c   :  { %v260_v20 = vadd.f32 %v259_v11, %v258_v2  ;;  %v343_v23 = vcombine.low %v241_v5, %v248_v6  ;;  %v255_v29 = vadd.f32 %v254_v10, %v253_v1  ;;  %v358_v32 = vrot.slane %v342_v12, %v666_v21 }
  0x4d   :  { %v449_v19 = vadd.f32 %v448_v4, %v447_v9 }
  0x4e   :  { %v261_v31 = vrot.slane %v260_v20, 1  ;;  %v365_v38 = vrot.slane %v343_v23, %v666_v21  ;;  %v373_v39 = vcombine.low %v351_v24, %v358_v32 }
  0x4f   :  { %v451_v28 = vadd.f32 %v450_v15, %v449_v19 }
  0x50   :  { %v262_v36 = vadd.f32 %v261_v31, %v260_v20  ;;  %v381_v42 = vrot.slane %v373_v39, %v666_v21 }
  0x51   :  { %v453_v35 = vadd.f32 %v452_v22, %v451_v28 }
  0x52   :  { %v344_v37 = vcombine.low %v255_v29, %v262_v36 }
  0x53   :  { %454 = vadd.xlane.f32.xlu0 %v453_v35 }
  0x54   :  { %v372_v40 = vrot.slane %v344_v37, %v666_v21 }
  0x56   :  { %v374_v41 = vcombine.low %v365_v38, %v372_v40 }
  0x58   :  { %v388_v43 = vrot.slane %v374_v41, %v666_v21 }
  0x5a   :  { %v389_v45 = vcombine.low %v381_v42, %v388_v43 }
  0x5c   :  { %v468_v46 = vrot.slane %v389_v45, %v400_v16  ;;  %v472_v47 = vrot.slane %v389_v45, %v404_v17  ;;  %v476_v48 = vrot.slane %v389_v45, %v408_v13  ;;  %v480_v49 = vrot.slane %v389_v45, %v412_v14 }
  0x5d   :  { %v484_v50 = vrot.slane %v389_v45, %v416_v27  ;;  %v488_v16 = vrot.slane %v389_v45, %v420_v33  ;;  %v492_v13 = vrot.slane %v389_v45, %v424_v34  ;;  %v496_v27 = vrot.slane %v389_v45, %v428_v44 }
  0x5e   :  { %v505_v51 = vsel %vm438_vm1, %v468_v46, 0.0  ;;  %v506_v21 = vsel %vm438_vm1, %v472_v47, 0.0  ;;  %v508_v52 = vsel %vm438_vm1, %v476_v48, 0.0  ;;  %v510_v17 = vsel %vm438_vm1, %v480_v49, 0.0 }
  0x5f   :  { %v507_v53 = vadd.f32 %v506_v21, %v505_v51  ;;  %v512_v14 = vsel %vm438_vm1, %v484_v50, 0.0  ;;  %v514_v7 = vsel %vm438_vm1, %v488_v16, 0.0  ;;  %v516_v55 = vsel %vm438_vm1, %v492_v13, 0.0 }
  0x60   :  { %v518_v33 = vsel %vm438_vm1, %v496_v27, 0.0 }
  0x61   :  { %v509_v54 = vadd.f32 %v508_v52, %v507_v53 }
  0x63   :  { %v511_v18 = vadd.f32 %v510_v17, %v509_v54 }
  0x65   :  { %v513_v26 = vadd.f32 %v512_v14, %v511_v18 }
  0x67   :  { %v515_v56 = vadd.f32 %v514_v7, %v513_v26 }
  0x69   :  { %v517_v57 = vadd.f32 %v516_v55, %v515_v56 }
  0x6b   :  { %v519_v25 = vadd.f32 %v518_v33, %v517_v57 }
  0x6d   :  { %520 = vadd.xlane.f32.xlu0 %v519_v25 }
  0xdc   :  { %v455_v58 = vpop.xlane.xlu0 %454 }
  0xdd   :  { %v456_v59 = vrot.slane %v455_v58, 4 }
  0xdf   :  { %v457_v34 = vadd.f32 %v456_v59, %v455_v58 }
  0xe1   :  { %v458_v60 = vrot.slane %v457_v34, 2 }
  0xe3   :  { %v459_v61 = vadd.f32 %v458_v60, %v457_v34 }
  0xe5   :  { %v460_v62 = vrot.slane %v459_v61, 1 }
  0xe7   :  { %v461_v63 = vadd.f32 %v460_v62, %v459_v61 }
  0xe9   :  { %554 = vpush %v461_v63 }
  0xf6   :  { %v521_v44 = vpop.xlane.xlu0 %520 }
  0xf7   :  { %v522_v0 = vrot.slane %v521_v44, 4 }
  0xf9   :  { %v523_v30 = vadd.f32 %v522_v0, %v521_v44 }
  0xfb   :  { %v524_v1 = vrot.slane %v523_v30, 2 }
  0xfd   :  { %v525_v2 = vadd.f32 %v524_v1, %v523_v30 }
  0xff   :  { %v526_v4 = vrot.slane %v525_v2, 1 }
 0x101   :  { %v527_v5 = vadd.f32 %v526_v4, %v525_v2 }
 0x103   :  { %556 = vpush %v527_v5 }
 0x11a   :  { %s555_s0 = spop %554 }
 0x11b   :  { %v535_v8 = vstv %s555_s0 }
 0x134   :  { %s557_s20 = spop %556 }
 0x135   :  { %v533_v6 = vstv %s557_s20 }
 0x136   :  { %v534_v9 = vsel %vm532_vm2, %v533_v6, 0.0 }
 0x137   :  { %v536_v10 = vsel %vm531_vm3, %v535_v8, %v534_v9 }
 0x138   :  { %537 = vst [vmem:[#allocation9] sm:$0xff] %v536_v10 }
 0x139   :  { %614 = shalt.err (!%p611_p0)
}
 0x13a   :  { %547 = dma.vmem_to_hbm [thread:$0]  %s545_s19, 128, %s785_s2, [#allocation6]  }
 0x13b   :  { %627 = dma.done.wait [#allocation6], 128  }
 0x13c   :  { %628 = vsyncadd [#allocation6], 4294967168 }
 0x13d   :  { %551 = vsyncpa [#allocation5], 1 }
 0x13e   :  { %552 = vsyncpa [#allocation8], 1 }
 0x13f   :  { %553 = vsyncpa [#allocation6], 1 }

</bundles_post_ra>
